<compile_context>
chip_gen: v7x
topology: tpu7x:2x2x1
jax: 0.10.0
libtpu: 0.0.40
codegen_flags: <defaults>
</compile_context>

<pallas_src>
import functools

import jax
import jax.numpy as jnp
from jax import lax
from jax.experimental import pallas as pl
from jax.experimental.pallas import tpu as pltpu

_LANES = 128


def _cdiv(a, b):
    return -(-a // b)


def _round_up(x, m):
    return ((x + m - 1) // m) * m


def _chip_info():
    """Return (per-core VMEM bytes, TensorCores per chip), defensively."""
    vmem = 128 * 1024 * 1024
    num_tc = 1
    kind = ""
    try:
        kind = jax.devices()[0].device_kind.lower()
    except Exception:
        pass
    try:
        cap = getattr(pltpu.get_tpu_info(), "vmem_capacity_bytes", None)
        if cap:
            vmem = int(cap)
    except Exception:
        pass
    if "v7" in kind:
        num_tc = 2                      # 2 TCs, each with its own HBM path
        vmem = min(vmem, 64 * 1024 * 1024)
    elif ("v4" in kind or "v5p" in kind) and "lite" not in kind:
        num_tc = 2                      # megacore
    vmem = max(32 * 1024 * 1024, min(vmem, 128 * 1024 * 1024))
    return vmem, num_tc


def _plan(units, unit_sub, bytes_per_unit, budget_bytes, num_tc, force_slices):
    """Split `units` of the streamed axis into (p parallel slices) x
    (k accumulation steps) of `tile` units each, with 2 inputs x 2 pipeline
    buffers x tile kept inside the VMEM budget and the last block guaranteed
    to start in-bounds."""
    cap = budget_bytes // (4 * bytes_per_unit)          # 2 inputs x 2 buffers
    cap = max(unit_sub, (cap // unit_sub) * unit_sub)
    if force_slices is not None:
        p_want = max(1, int(force_slices))
    else:
        p_want = 2 if num_tc >= 2 else 1                # never split on 1-TC chips
    p_want = min(p_want, max(1, units // unit_sub))

    p = k = tile = 1
    for p in range(p_want, 0, -1):
        per_slice = _cdiv(units, p)
        tile = min(cap, _round_up(per_slice, unit_sub))
        k = _cdiv(per_slice, tile)
        # Rebalance so the last step is not mostly padding.
        tile = min(tile, _round_up(_cdiv(per_slice, k), unit_sub))
        if p == 1 and k == 1:
            tile = units          # single block == full axis: always legal
        if (p * k - 1) * tile < units:   # last block starts in-bounds
            break
    need_mask = (p * k * tile) != units
    return p, k, tile, need_mask


def _loss_rows_kernel(e1_ref, e2_ref, out_ref, *, rows, rows_tile, k_steps,
                      need_mask):
    """Lane-aligned path. Blocks (B, rows_tile, 128); resident (B, 128) output
    block accumulates the per-lane sum of squares across the k axis."""
    pi = pl.program_id(0)
    ki = pl.program_id(1)
    d = e1_ref[...].astype(jnp.float32) - e2_ref[...].astype(jnp.float32)
    if need_mask:
        # Zero rows past the end of the (possibly partial) last block.
        limit = rows - (pi * k_steps + ki) * rows_tile
        row_idx = lax.broadcasted_iota(jnp.int32, (rows_tile, _LANES), 0)
        d = jnp.where(row_idx[None, :, :] < limit, d, 0.0)
    contrib = jnp.sum(d * d, axis=1)                     # (B, 128)

    @pl.when(ki == 0)
    def _():
        out_ref[...] = contrib

    @pl.when(ki > 0)
    def _():
        out_ref[...] += contrib


def _loss_cols_kernel(e1_ref, e2_ref, out_ref, *, f, tile_f, k_steps,
                      need_mask):
    """Ragged-F path. Blocks (B, tile_f); resident (B, 1) output block
    accumulates the per-sample sum of squares across the k axis."""
    pi = pl.program_id(0)
    ki = pl.program_id(1)
    d = e1_ref[...].astype(jnp.float32) - e2_ref[...].astype(jnp.float32)
    if need_mask:
        # Zero flat feature indices >= f (tail of the last block).
        limit = f - (pi * k_steps + ki) * tile_f
        col_idx = lax.broadcasted_iota(jnp.int32, d.shape, 1)
        d = jnp.where(col_idx < limit, d, 0.0)
    contrib = jnp.sum(d * d, axis=1, keepdims=True)      # (B, 1)

    @pl.when(ki == 0)
    def _():
        out_ref[...] = contrib

    @pl.when(ki > 0)
    def _():
        out_ref[...] += contrib


def _reference_impl(embed1, embed2, size_average):
    """Pure-jnp reference; also the tiny-input / huge-batch fallback path."""
    diff = (embed1 - embed2).reshape(embed1.shape[0], -1).astype(jnp.float32)
    dist = jnp.sqrt(jnp.sum(diff * diff, axis=1))
    return jnp.mean(dist) if size_average else jnp.sum(dist)


def regression_loss(embed1, embed2, size_average=True, *,
                    vmem_budget_bytes=None, vmem_limit_bytes=None,
                    force_slices=None, force_pallas=False,
                    min_pallas_bytes=256 * 1024):
    """Pallas TPU RegressionLoss. embed1/embed2: (B, ...) of identical shape."""
    assert embed1.shape == embed2.shape, "embed1/embed2 must have equal shapes"
    assert embed1.dtype == embed2.dtype, "embed1/embed2 must have equal dtypes"

    b = embed1.shape[0]
    f = 1
    for dim in embed1.shape[1:]:
        f *= dim
    itemsize = jnp.dtype(embed1.dtype).itemsize

    # Small-input fast path: pallas_call fixed cost dominates; let XLA fuse it.
    if not force_pallas and (2 * b * f * itemsize) < min_pallas_bytes:
        return _reference_impl(embed1, embed2, size_average)

    vmem_cap, num_tc = _chip_info()
    if vmem_budget_bytes is None:
        vmem_budget_bytes = (vmem_cap * 3) // 8      # 2 inputs x 2 buffers
    if vmem_limit_bytes is None:
        vmem_limit_bytes = (vmem_cap * 5) // 8

    sub = max(8, 32 // max(1, itemsize))             # sublane multiple per dtype
    b_pad = _round_up(b, sub)
    if 4 * b_pad * sub * _LANES * itemsize > vmem_limit_bytes:
        # TODO(synk): tile the batch axis instead of falling back for huge B.
        return _reference_impl(embed1, embed2, size_average)

    compiler_params = pltpu.CompilerParams(
        dimension_semantics=("parallel", "arbitrary"),
        vmem_limit_bytes=int(vmem_limit_bytes),
    )

    if f % _LANES == 0:
        # Lane-dense path: each sample viewed as (rows, 128); blocks use all 8
        # sublanes regardless of B.  Free reshape, no padding copy.
        rows = f // _LANES
        p, k_steps, rows_tile, need_mask = _plan(
            rows, sub, b * _LANES * itemsize, vmem_budget_bytes, num_tc,
            force_slices)
        e1 = embed1.reshape(b, rows, _LANES)
        e2 = embed2.reshape(b, rows, _LANES)
        in_spec = pl.BlockSpec((b, rows_tile, _LANES),
                               lambda pi, ki: (0, pi * k_steps + ki, 0))
        out_spec = pl.BlockSpec((None, b, _LANES), lambda pi, ki: (pi, 0, 0))
        out_lanes = _LANES
        kernel = functools.partial(_loss_rows_kernel, rows=rows,
                                   rows_tile=rows_tile, k_steps=k_steps,
                                   need_mask=need_mask)
    else:
        # Ragged F: stream (B, tile_f) blocks straight from the (B, F) view and
        # mask the tail in-kernel -- no wrapper-side jnp.pad / extra HBM pass.
        units = _cdiv(f, _LANES)
        p, k_steps, tile_u, _ = _plan(
            units, 1, b_pad * _LANES * itemsize, vmem_budget_bytes, num_tc,
            force_slices)
        if p == 1 and k_steps == 1:
            tile_f, need_mask = f, False             # single full-width block
        else:
            tile_f, need_mask = tile_u * _LANES, True
        e1 = embed1.reshape(b, f)
        e2 = embed2.reshape(b, f)
        in_spec = pl.BlockSpec((b, tile_f),
                               lambda pi, ki: (0, pi * k_steps + ki))
        out_spec = pl.BlockSpec((None, b, 1), lambda pi, ki: (pi, 0, 0))
        out_lanes = 1
        kernel = functools.partial(_loss_cols_kernel, f=f, tile_f=tile_f,
                                   k_steps=k_steps, need_mask=need_mask)

    partial_ss = pl.pallas_call(
        kernel,
        out_shape=jax.ShapeDtypeStruct((p, b, out_lanes), jnp.float32),
        grid_spec=pltpu.PrefetchScalarGridSpec(
            num_scalar_prefetch=0,
            grid=(p, k_steps),
            in_specs=[in_spec, in_spec],
            out_specs=out_spec,
        ),
        compiler_params=compiler_params,
    )(e1, e2)

    # O(B) epilogue: combine per-slice / per-lane partials, sqrt, reduce.
    ss = jnp.sum(partial_ss, axis=(0, 2))            # (B,) sum of squares
    # TODO(synk): add a custom_vjp with an eps-guarded sqrt if this loss is
    # ever used for training (forward-only here, matching the reference).
    dist = jnp.sqrt(ss)
    return jnp.mean(dist) if size_average else jnp.sum(dist)


if __name__ == "__main__":
    key = jax.random.PRNGKey(0)
    ks = jax.random.split(key, 10)

    # 1) Primary: (B, C, H, W) = (2, 4, 16, 16), F = 1024 (lane-aligned path).
    x1 = jax.random.normal(ks[0], (2, 4, 16, 16), jnp.float32)
    x2 = jax.random.normal(ks[1], (2, 4, 16, 16), jnp.float32)
    got_mean = jax.block_until_ready(
        regression_loss(x1, x2, True, force_pallas=True))
    got_sum = jax.block_until_ready(
        regression_loss(x1, x2, False, force_pallas=True))
    assert jnp.allclose(got_mean, _reference_impl(x1, x2, True),
                        rtol=1e-5, atol=1e-5)
    assert jnp.allclose(got_sum, _reference_impl(x1, x2, False),
                        rtol=1e-5, atol=1e-5)

    # 2) Ragged feature size (F = 969): no wrapper pad, single (B, F) block.
    a1 = jax.random.normal(ks[2], (2, 3, 17, 19), jnp.float32)
    a2 = jax.random.normal(ks[3], (2, 3, 17, 19), jnp.float32)
    got = jax.block_until_ready(regression_loss(a1, a2, True, force_pallas=True))
    assert jnp.allclose(got, _reference_impl(a1, a2, True), rtol=1e-5, atol=1e-5)

    # 3) Ragged + tiny budget: multi-step path with in-kernel tail masking.
    got = jax.block_until_ready(
        regression_loss(a1, a2, False, force_pallas=True,
                        vmem_budget_bytes=16 * 1024))
    assert jnp.allclose(got, _reference_impl(a1, a2, False), rtol=1e-5, atol=1e-5)

    # 4) Aligned + tiny budget + forced 2 slices: exercises the two-slice
    #    ("both TensorCores on v7x") grid and k-axis accumulation into out_ref,
    #    even on single-TensorCore chips.
    b1 = jax.random.normal(ks[4], (2, 8, 32, 32), jnp.float32)   # F=8192, rows=64
    b2 = jax.random.normal(ks[5], (2, 8, 32, 32), jnp.float32)
    got = jax.block_until_ready(
        regression_loss(b1, b2, False, force_pallas=True,
                        vmem_budget_bytes=64 * 1024, force_slices=2))
    assert jnp.allclose(got, _reference_impl(b1, b2, False), rtol=1e-5, atol=1e-5)

    # 5) Aligned but rows (=9) not divisible by the row tile: in-kernel row mask.
    c1 = jax.random.normal(ks[6], (2, 9, 16, 8), jnp.float32)    # F=1152, rows=9
    c2 = jax.random.normal(ks[7], (2, 9, 16, 8), jnp.float32)
    got = jax.block_until_ready(
        regression_loss(c1, c2, True, force_pallas=True,
                        vmem_budget_bytes=16 * 1024))
    assert jnp.allclose(got, _reference_impl(c1, c2, True), rtol=1e-5, atol=1e-5)

    # 6) bf16 inputs stream at half the HBM bytes and upcast in-kernel.
    d1 = jax.random.normal(ks[8], (2, 4, 16, 16), jnp.bfloat16)
    d2 = jax.random.normal(ks[9], (2, 4, 16, 16), jnp.bfloat16)
    got = jax.block_until_ready(regression_loss(d1, d2, True, force_pallas=True))
    assert jnp.allclose(got, _reference_impl(d1, d2, True), rtol=2e-2, atol=2e-2)

    # 7) Tiny-input fast path (no pallas_call) still matches.
    got = jax.block_until_ready(regression_loss(x1, x2, True))
    assert jnp.allclose(got, _reference_impl(x1, x2, True), rtol=1e-5, atol=1e-5)

    print("KERNEL_OK")
</pallas_src>

<mosaic_0001>
module attributes {stable_mosaic.version = 11 : i64} {
  func.func @_loss_rows_kernel(%arg0: i32, %arg1: i32, %arg2: memref<2x8x128xf32, #tpu.memory_space<vmem>>, %arg3: memref<2x8x128xf32, #tpu.memory_space<vmem>>, %arg4: memref<1x2x128xf32, #tpu.memory_space<vmem>>) attributes {dimension_semantics = [#tpu.dimension_semantics<parallel>, #tpu.dimension_semantics<arbitrary>], iteration_bounds = array<i64: 1, 1>, scalar_prefetch = 0 : i64, scratch_operands = 0 : i64, tpu.core_type = #tpu.core_type<tc>, window_params = [{transform_indices = @transform_0, window_bounds = array<i64: 2, 8, 128>}, {transform_indices = @transform_1, window_bounds = array<i64: 2, 8, 128>}, {transform_indices = @transform_2, window_bounds = array<i64: 1, 2, 128>}]} {
    %c0 = arith.constant 0 : index
    %c0_0 = arith.constant 0 : index
    %c0_1 = arith.constant 0 : index
    %0 = vector.load %arg2[%c0, %c0_0, %c0_1] : memref<2x8x128xf32, #tpu.memory_space<vmem>>, vector<2x8x128xf32>
    %c0_2 = arith.constant 0 : index
    %c0_3 = arith.constant 0 : index
    %c0_4 = arith.constant 0 : index
    %1 = vector.load %arg3[%c0_2, %c0_3, %c0_4] : memref<2x8x128xf32, #tpu.memory_space<vmem>>, vector<2x8x128xf32>
    %2 = arith.subf %0, %1 : vector<2x8x128xf32>
    %3 = arith.mulf %2, %2 : vector<2x8x128xf32>
    %cst = arith.constant dense<0.000000e+00> : vector<2x128xf32>
    %4 = vector.multi_reduction <add>, %3, %cst [1] : vector<2x8x128xf32> to vector<2x128xf32>
    %c0_i32 = arith.constant 0 : i32
    %5 = arith.cmpi eq, %arg1, %c0_i32 : i32
    %6 = arith.extui %5 : i1 to i32
    %c0_i32_5 = arith.constant 0 : i32
    %7 = arith.cmpi ne, %6, %c0_i32_5 : i32
    scf.if %7 {
      %c0_8 = arith.constant 0 : index
      %c0_9 = arith.constant 0 : index
      %c0_10 = arith.constant 0 : index
      %11 = vector.load %arg4[%c0_8, %c0_9, %c0_10] : memref<1x2x128xf32, #tpu.memory_space<vmem>>, vector<1x2x128xf32>
      %12 = vector.shape_cast %11 : vector<1x2x128xf32> to vector<2x128xf32>
      %13 = vector.shape_cast %4 : vector<2x128xf32> to vector<1x2x128xf32>
      tpu.vector_store %arg4[%c0_8, %c0_9, %c0_10], %13 {strides = array<i32>} : memref<1x2x128xf32, #tpu.memory_space<vmem>>, vector<1x2x128xf32>,
    } else {
    }
    %c0_i32_6 = arith.constant 0 : i32
    %8 = arith.cmpi sgt, %arg1, %c0_i32_6 : i32
    %9 = arith.extui %8 : i1 to i32
    %c0_i32_7 = arith.constant 0 : i32
    %10 = arith.cmpi ne, %9, %c0_i32_7 : i32
    scf.if %10 {
      %c0_8 = arith.constant 0 : index
      %c0_9 = arith.constant 0 : index
      %c0_10 = arith.constant 0 : index
      %11 = vector.load %arg4[%c0_8, %c0_9, %c0_10] : memref<1x2x128xf32, #tpu.memory_space<vmem>>, vector<1x2x128xf32>
      %12 = vector.shape_cast %11 : vector<1x2x128xf32> to vector<2x128xf32>
      %13 = arith.addf %12, %4 : vector<2x128xf32>
      %c0_11 = arith.constant 0 : index
      %c0_12 = arith.constant 0 : index
      %c0_13 = arith.constant 0 : index
      %14 = vector.load %arg4[%c0_11, %c0_12, %c0_13] : memref<1x2x128xf32, #tpu.memory_space<vmem>>, vector<1x2x128xf32>
      %15 = vector.shape_cast %14 : vector<1x2x128xf32> to vector<2x128xf32>
      %16 = vector.shape_cast %13 : vector<2x128xf32> to vector<1x2x128xf32>
      tpu.vector_store %arg4[%c0_11, %c0_12, %c0_13], %16 {strides = array<i32>} : memref<1x2x128xf32, #tpu.memory_space<vmem>>, vector<1x2x128xf32>,
    } else {
    }
    return
  }
  func.func @transform_0(%arg0: i32, %arg1: i32) -> (i32, i32, i32) {
    %c1_i32 = arith.constant 1 : i32
    %0 = arith.muli %arg0, %c1_i32 : i32
    %1 = arith.addi %0, %arg1 : i32
    %c0_i32 = arith.constant 0 : i32
    %c0_i32_0 = arith.constant 0 : i32
    %c0_i32_1 = arith.constant 0 : i32
    return %c0_i32, %1, %c0_i32_0 : i32, i32, i32
  }
  func.func @transform_1(%arg0: i32, %arg1: i32) -> (i32, i32, i32) {
    %c1_i32 = arith.constant 1 : i32
    %0 = arith.muli %arg0, %c1_i32 : i32
    %1 = arith.addi %0, %arg1 : i32
    %c0_i32 = arith.constant 0 : i32
    %c0_i32_0 = arith.constant 0 : i32
    %c0_i32_1 = arith.constant 0 : i32
    return %c0_i32, %1, %c0_i32_0 : i32, i32, i32
  }
  func.func @transform_2(%arg0: i32, %arg1: i32) -> (i32, i32, i32) {
    %c0_i32 = arith.constant 0 : i32
    %c0_i32_0 = arith.constant 0 : i32
    %c0_i32_1 = arith.constant 0 : i32
    return %arg0, %c0_i32, %c0_i32_0 : i32, i32, i32
  }
}

</mosaic_0001>

<bundles_post_ra>
// kernel: tpu_custom_call.1
= control target key start
LH: loop header
LB: loop body
LE: loop exit
PB: predicated region body
PF: predicated region fallthrough
CT: control target
= control target key end

     0   :  { %7 = vsyncpa [#allocation3], 0  ;;  %s239_s0 = inlined_call_operand.hbm [shape: f32[2,8,128], index: 0, kind: input, shape index: {}]   ;;  %s240_s1 = inlined_call_operand.hbm [shape: f32[2,8,128], index: 1, kind: input, shape index: {}]   ;;  %s241_s2 = inlined_call_operand.hbm [shape: f32[1,2,128], index: 2, kind: output, shape index: {}]  }
   0x1   :  { %8 = vsyncpa [#allocation6], 0 }
   0x2   :  { %9 = vsyncpa [#allocation4], 0  ;;  %s183_s9 = smov [#allocation2]   ;;  %s111_s13 = scalar_lea.hbm %s239_s0, 256 }
   0x3   :  { %s18_s10 = sshll.u32 %s183_s9, 4  ;;  %p112_p0 = scmp.ne.s32.totalorder %s239_s0, %s111_s13  ;;  %s19_s10 = int_to_ptr.vmem [resolvable:$true] %s18_s10 }
   0x4   :  { %p115_p1 = scmp.lt.u32.totalorder %s111_s13, %s239_s0 }
   0x6   :  { %p117_p2 = pnand %p115_p1, %p112_p0 }
   0x8   :  { %120 = shalt.err (!%p117_p2)
}
   0x9   :  { %s121_s18 = scalar_lea.vmem %s19_s10, 256  ;;  %p126_p4 = scmp.lt.s32.totalorder %s19_s10, %s19_s10 }
   0xa   :  { %p122_p3 = scmp.ne.s32.totalorder %s19_s10, %s121_s18  ;;  %p127_p5 = scmp.lt.s32.totalorder %s121_s18, %s121_s18 }
   0xc   :  { %p128_p6 = por %p127_p5, %p126_p4 }
   0xe   :  { %p129_p7 = pnand %p128_p6, %p122_p3 }
  0x10   :  { %132 = shalt.err (!%p129_p7)
}
  0x11   :  { %s184_s19 = smov 128   ;;  %s185_s20 = smov 8  }
  0x12   :  { %24 = dma.hbm_to_vmem [thread:$0]  %s239_s0, 256, %s19_s10, [#allocation3], %s184_s19, %s184_s19, %s185_s20  }
  0x13   :  { %s186_s23 = smov [#allocation5]   ;;  %s133_s27 = scalar_lea.hbm %s240_s1, 256 }
  0x14   :  { %s33_s24 = sshll.u32 %s186_s23, 4  ;;  %p134_p8 = scmp.ne.s32.totalorder %s240_s1, %s133_s27  ;;  %s34_s24 = int_to_ptr.vmem [resolvable:$true] %s33_s24 }
  0x15   :  { %p137_p9 = scmp.lt.u32.totalorder %s133_s27, %s240_s1 }
  0x17   :  { %p139_p10 = pnand %p137_p9, %p134_p8 }
  0x19   :  { %142 = shalt.err (!%p139_p10)
}
  0x1a   :  { %s143_s4 = scalar_lea.vmem %s34_s24, 256  ;;  %p148_p12 = scmp.lt.s32.totalorder %s34_s24, %s34_s24 }
  0x1b   :  { %p144_p11 = scmp.ne.s32.totalorder %s34_s24, %s143_s4  ;;  %p149_p13 = scmp.lt.s32.totalorder %s143_s4, %s143_s4 }
  0x1d   :  { %p150_p0 = por %p149_p13, %p148_p12 }
  0x1f   :  { %p151_p1 = pnand %p150_p0, %p144_p11 }
  0x21   :  { %154 = shalt.err (!%p151_p1)
}
  0x22   :  { %39 = dma.hbm_to_vmem [thread:$0]  %s240_s1, 256, %s34_s24, [#allocation6], %s184_s19, %s184_s19, %s185_s20  }
  0x23   :  { %177 = dma.done.wait [#allocation3], 256  }
  0x24   :  { %178 = vsyncadd [#allocation3], 4294967040 }
  0x25   :  { %179 = dma.done.wait [#allocation6], 256  }
  0x26   :  { %180 = vsyncadd [#allocation6], 4294967040  ;;  %v48_v0 = vld [vmem:[#allocation2] sm:$0xff]  ;;  %v49_v1 = vld [vmem:[#allocation2 + $0x8] sm:$0xff]  ;;  %s187_s1 = smov [#allocation7]   ;;  %vm74_vm0 = vcmask 1041409  }
  0x27   :  { %v50_v2 = vld [vmem:[#allocation5] sm:$0xff]  ;;  %v51_v3 = vld [vmem:[#allocation5 + $0x8] sm:$0xff]  ;;  %s96_s6 = sshll.u32 %s187_s1, 4  ;;  %s97_s6 = int_to_ptr.vmem [resolvable:$true] %s96_s6 }
  0x28   :  { %v52_v4 = vsub.f32 %v48_v0, %v50_v2  ;;  %v53_v5 = vsub.f32 %v49_v1, %v51_v3  ;;  %s155_s7 = scalar_lea.vmem %s97_s6, 32  ;;  %p160_p3 = scmp.lt.s32.totalorder %s97_s6, %s97_s6 }
  0x29   :  { %p156_p2 = scmp.ne.s32.totalorder %s97_s6, %s155_s7  ;;  %p161_p4 = scmp.lt.s32.totalorder %s155_s7, %s155_s7 }
  0x2a   :  { %v54_v6 = vmul.f32 %v52_v4, %v52_v4  ;;  %v55_v7 = vmul.f32 %v53_v5, %v53_v5 }
  0x2b   :  { %p162_p5 = por %p161_p4, %p160_p3 }
  0x2c   :  { %v56_v8 = vrot.slane %v54_v6, 4  ;;  %v62_v9 = vrot.slane %v55_v7, 4 }
  0x2d   :  { %p163_p6 = pnand %p162_p5, %p156_p2 }
  0x2e   :  { %v57_v10 = vadd.f32 %v56_v8, %v54_v6  ;;  %v63_v11 = vadd.f32 %v62_v9, %v55_v7 }
  0x30   :  { %v58_v12 = vrot.slane %v57_v10, 2  ;;  %v64_v13 = vrot.slane %v63_v11, 2 }
  0x32   :  { %v59_v14 = vadd.f32 %v58_v12, %v57_v10  ;;  %v65_v15 = vadd.f32 %v64_v13, %v63_v11 }
  0x34   :  { %v60_v16 = vrot.slane %v59_v14, 1  ;;  %v66_v17 = vrot.slane %v65_v15, 1 }
  0x36   :  { %v61_v18 = vadd.f32 %v60_v16, %v59_v14  ;;  %v67_v19 = vadd.f32 %v66_v17, %v65_v15 }
  0x38   :  { %v75_v20 = vsel %vm74_vm0, %v67_v19, %v61_v18 }
  0x39   :  { %77 = vst [vmem:[#allocation7] sm:$0x3] %v75_v20 }
  0x3a   :  { %166 = shalt.err (!%p163_p6)
}
  0x3b   :  { %s167_s10 = scalar_lea.hbm %s241_s2, 32 }
  0x3c   :  { %p168_p7 = scmp.ne.s32.totalorder %s241_s2, %s167_s10  ;;  %p171_p8 = scmp.lt.u32.totalorder %s167_s10, %s241_s2 }
  0x3e   :  { %p173_p9 = pnand %p171_p8, %p168_p7 }
  0x40   :  { %176 = shalt.err (!%p173_p9)
}
  0x41   :  { %99 = dma.vmem_to_hbm [thread:$0]  %s97_s6, 32, %s241_s2, [#allocation4]  }
  0x42   :  { %181 = dma.done.wait [#allocation4], 32  }
  0x43   :  { %182 = vsyncadd [#allocation4], 4294967264 }
  0x44   :  { %103 = vsyncpa [#allocation3], 1 }
  0x45   :  { %104 = vsyncpa [#allocation6], 1 }
  0x46   :  { %105 = vsyncpa [#allocation4], 1 }

</bundles_post_ra>
